<compile_context>
chip_gen: v7x
topology: tpu7x:2x2x1
jax: 0.10.0
libtpu: 0.0.40
codegen_flags: <defaults>
</compile_context>

<pallas_src>
import jax
import jax.numpy as jnp
from jax.experimental import pallas as pl
from jax.experimental.pallas import tpu as pltpu


# ----------------------------- Pallas kernel --------------------------------
def _val_kernel(x_ref, rel_ref,
                w_pos_ref, b_pos_ref,
                w_exp_ref, b_exp_ref,
                w1_ref, b1_ref,
                w2_ref, b2_ref,
                w_br_ref, b_br_ref,
                w_shr_ref, b_shr_ref,
                out_ref):
    f32 = jnp.float32
    cdt = w_exp_ref.dtype                 # MXU input dtype (bf16)

    x = x_ref[...]                        # (tile_p, C)   bf16
    rel = rel_ref[...]                    # (tile_p, 2J)  bf16

    # pos_emb_conv : 1x1 conv over channels, with bias (f32 accumulate)
    pos_emb = jnp.dot(rel, w_pos_ref[...], preferred_element_type=f32) + b_pos_ref[...]

    # expand_conv -> expand_bn(folded) -> ReLU (dropout == identity), then + pos_emb.
    # Keep the activation in bf16 afterwards: it only feeds bf16 MXU inputs.
    h = jnp.dot(x, w_exp_ref[...], preferred_element_type=f32)
    h = (jnp.maximum(h + b_exp_ref[...], 0.0) + pos_emb).astype(cdt)   # (tile_p, C) bf16

    # residual block (num_layers == 1, two conv+bn+relu stages, BN folded)
    y = jnp.dot(h, w1_ref[...], preferred_element_type=f32)
    y = jnp.maximum(y + b1_ref[...], 0.0).astype(cdt)
    y = jnp.dot(y, w2_ref[...], preferred_element_type=f32)
    y = jnp.maximum(y + b2_ref[...], 0.0).astype(cdt)
    h = h + y                                                           # bf16 residual add

    # fused ag/att branches:
    #   w_br  = [w_ag*s_ag | w_att*s_att]           -> one (tile_p, 2C) activation
    #   w_shr = block-diag([w_ag_shr], [w_att_shr]) padded to out_pad lanes
    a = jnp.dot(h, w_br_ref[...], preferred_element_type=f32)
    a = jnp.maximum(a + b_br_ref[...], 0.0).astype(cdt)
    out = jnp.dot(a, w_shr_ref[...], preferred_element_type=f32) + b_shr_ref[...]
    out_ref[...] = out.astype(out_ref.dtype)          # narrow bf16 store (HBM-byte cheap)


# --------------------------- param preprocessing ------------------------------
def _round_up(v, m):
    return ((v + m - 1) // m) * m


def _prepare_kernel_params(params, out_pad, w_dtype=jnp.bfloat16):
    """Fold BN scales into conv weights, fuse branches, pad shrink to out_pad lanes."""
    f32 = jnp.float32
    C = params["w_exp"].shape[0]
    Cout = params["w_ag_shr"].shape[1]

    def fold(w, s):  # w: (Cin, Cw), s: (1, Cw) per-output-channel BN scale
        return (w.astype(f32) * s.astype(f32)).astype(w_dtype)

    w_pos = params["w_pos"].astype(w_dtype)
    b_pos = params["b_pos"].astype(f32)
    w_exp = fold(params["w_exp"], params["s_exp"])
    b_exp = params["b_exp"].astype(f32)
    w1 = fold(params["w1"], params["s1"])
    b1 = params["b1"].astype(f32)
    w2 = fold(params["w2"], params["s2"])
    b2 = params["b2"].astype(f32)

    # fused branch first stage: (C, 2C)
    w_br = jnp.concatenate([fold(params["w_ag"], params["s_ag"]),
                            fold(params["w_att"], params["s_att"])], axis=1)
    b_br = jnp.concatenate([params["b_ag"], params["b_att"]], axis=1).astype(f32)

    # fused shrink: block-structured (2C, out_pad); cols [0:Cout]=ag, [Cout]=att
    w_shr = jnp.zeros((2 * C, out_pad), f32)
    w_shr = w_shr.at[:C, :Cout].set(params["w_ag_shr"].astype(f32))
    w_shr = w_shr.at[C:, Cout:Cout + 1].set(params["w_att_shr"].astype(f32))
    w_shr = w_shr.astype(w_dtype)
    b_shr = jnp.zeros((1, out_pad), f32)
    b_shr = b_shr.at[0, :Cout].set(params["b_ag_shr"][0])
    b_shr = b_shr.at[0, Cout].set(params["b_att_shr"][0, 0])

    return [w_pos, b_pos, w_exp, b_exp, w1, b1, w2, b2, w_br, b_br, w_shr, b_shr]


def _choose_tile_p(P, tile_p_max):
    """>= 8 grid steps (>= 4 per v7x TensorCore) at small P; 16-row aligned (bf16)."""
    target_steps = 8
    tile = (max(P // target_steps, 16) // 16) * 16
    return int(max(16, min(tile_p_max, tile)))


# ------------------------------- wrapper -------------------------------------
def val_forward_pallas(x, pos_2d, params, *, tile_p_max=2048, compute_dtype=jnp.bfloat16):
    """x: (B,C,T,N) NCHW-style; pos_2d: (B,T,J,Cp,N_view). Returns (ag, att)."""
    B, C, T, N = x.shape
    Nv = int(round(N ** 0.5))
    Cout = params["w_ag_shr"].shape[1]
    out_pad = _round_up(Cout + 1, 16)           # merged narrow output width (bf16)

    # ---- glue: build rel_pos exactly like the torch module ----
    p = pos_2d[:, :, :, :2, :]                      # (B,T,J,2,Nv)
    p = jnp.transpose(p, (0, 2, 3, 1, 4))           # (B,J,2,T,Nv)
    p = p.reshape(B, -1, T, Nv)                     # (B,2J,T,Nv)
    rel = p[:, :, :, :, None] - p[:, :, :, None, :]  # (B,2J,T,Nv,Nv)
    rel = rel.reshape(B, -1, T, N)                  # (B,2J,T,N)
    J2 = rel.shape[1]

    # ---- layout change: NCHW -> pixels x channels, cast streamed inputs to bf16 ----
    # (Required by the NCHW module interface; CostEstimate below lets XLA schedule
    #  these passes sensibly around the custom call.)
    x_pix = jnp.transpose(x, (0, 2, 3, 1)).reshape(-1, C).astype(compute_dtype)
    rel_pix = jnp.transpose(rel, (0, 2, 3, 1)).reshape(-1, J2).astype(compute_dtype)
    P = x_pix.shape[0]

    tile_p = _choose_tile_p(P, tile_p_max)
    pad = (-P) % tile_p
    if pad:
        x_pix = jnp.pad(x_pix, ((0, pad), (0, 0)))
        rel_pix = jnp.pad(rel_pix, ((0, pad), (0, 0)))
    Pp = P + pad
    grid = (Pp // tile_p,)

    kparams = _prepare_kernel_params(params, out_pad, compute_dtype)

    in_specs = ([pl.BlockSpec((tile_p, C), lambda i: (i, 0)),
                 pl.BlockSpec((tile_p, J2), lambda i: (i, 0))]
                + [pl.BlockSpec(kp.shape, lambda i: (0, 0)) for kp in kparams])
    out_specs = pl.BlockSpec((tile_p, out_pad), lambda i: (i, 0))

    # Advisory cost estimate: matmul flops + streamed/weight bytes.
    flops_per_pix = 2 * (J2 * C + 3 * C * C + C * 2 * C + 2 * C * out_pad)
    weight_bytes = sum(int(kp.size) * kp.dtype.itemsize for kp in kparams)
    cost = pl.CostEstimate(
        flops=int(flops_per_pix) * int(Pp),
        transcendentals=0,
        bytes_accessed=int(Pp) * (2 * (C + J2) + 2 * out_pad) + weight_bytes,
    )

    out = pl.pallas_call(
        _val_kernel,
        grid=grid,
        in_specs=in_specs,
        out_specs=out_specs,
        out_shape=jax.ShapeDtypeStruct((Pp, out_pad), compute_dtype),
        compiler_params=pltpu.CompilerParams(
            dimension_semantics=("parallel",)),
        cost_estimate=cost,
    )(x_pix, rel_pix, *kparams)

    # ---- glue: split merged output, back to torch layout (B, C, T, Nv, Nv) ----
    ag = out[:P, :Cout].astype(jnp.float32).reshape(B, T, N, Cout).transpose(0, 3, 1, 2)
    ag = ag.reshape(B, Cout, T, Nv, Nv)
    att = out[:P, Cout:Cout + 1].astype(jnp.float32).reshape(B, T, N, 1).transpose(0, 3, 1, 2)
    att = att.reshape(B, 1, T, Nv, Nv)
    return ag, att


# --------------------------- parameter setup ---------------------------------
def _fold_bn(gamma, beta, mean, var, eps=1e-5):
    scale = gamma / jnp.sqrt(var + eps)
    bias = beta - mean * scale
    return scale.reshape(1, -1), bias.reshape(1, -1)


def make_params(key, in_channels, out_channels, num_joints):
    C = in_channels
    J2 = 2 * num_joints
    ks = list(jax.random.split(key, 32))
    k = iter(ks)

    def conv_w(cin, cout):
        # torch Conv2d(cout, cin, 1, 1) weight, pre-transposed to (cin, cout)
        return (jax.random.normal(next(k), (cout, cin), jnp.float32) * 0.1).T

    def bn(c):
        gamma = 0.8 + 0.4 * jax.random.uniform(next(k), (c,), jnp.float32)
        beta = 0.1 * jax.random.normal(next(k), (c,), jnp.float32)
        mean = 0.1 * jax.random.normal(next(k), (c,), jnp.float32)
        var = 0.5 + jax.random.uniform(next(k), (c,), jnp.float32)
        return _fold_bn(gamma, beta, mean, var)

    params = {}
    params["w_pos"] = conv_w(J2, C)
    params["b_pos"] = (0.1 * jax.random.normal(next(k), (C,), jnp.float32)).reshape(1, -1)
    params["w_exp"] = conv_w(C, C)
    params["s_exp"], params["b_exp"] = bn(C)
    params["w1"] = conv_w(C, C)
    params["s1"], params["b1"] = bn(C)
    params["w2"] = conv_w(C, C)
    params["s2"], params["b2"] = bn(C)
    params["w_ag"] = conv_w(C, C)
    params["s_ag"], params["b_ag"] = bn(C)
    params["w_ag_shr"] = conv_w(C, out_channels)
    params["b_ag_shr"] = (0.1 * jax.random.normal(next(k), (out_channels,),
                                                  jnp.float32)).reshape(1, -1)
    params["w_att"] = conv_w(C, C)
    params["s_att"], params["b_att"] = bn(C)
    params["w_att_shr"] = conv_w(C, 1)
    params["b_att_shr"] = (0.1 * jax.random.normal(next(k), (1,), jnp.float32)).reshape(1, -1)
    return params


# ------------------------- pure-JAX reference (f32) ---------------------------
def val_forward_ref(x, pos_2d, params):
    B, C, T, N = x.shape
    Nv = int(round(N ** 0.5))

    def conv1x1(z, w_t, b=None):
        y = jnp.einsum("bctn,cd->bdtn", z, w_t)
        if b is not None:
            y = y + b.reshape(1, -1, 1, 1)
        return y

    def bnrelu(z, s, bb):
        return jnp.maximum(z * s.reshape(1, -1, 1, 1) + bb.reshape(1, -1, 1, 1), 0.0)

    p = pos_2d[:, :, :, :2, :]
    p = jnp.transpose(p, (0, 2, 3, 1, 4)).reshape(B, -1, T, Nv)
    rel = (p[:, :, :, :, None] - p[:, :, :, None, :]).reshape(B, -1, T, N)

    pos_emb = conv1x1(rel, params["w_pos"], params["b_pos"][0])
    h = bnrelu(conv1x1(x, params["w_exp"]), params["s_exp"][0], params["b_exp"][0]) + pos_emb
    res = h
    y = bnrelu(conv1x1(h, params["w1"]), params["s1"][0], params["b1"][0])
    y = bnrelu(conv1x1(y, params["w2"]), params["s2"][0], params["b2"][0])
    h = res + y
    a = bnrelu(conv1x1(h, params["w_ag"]), params["s_ag"][0], params["b_ag"][0])
    ag = conv1x1(a, params["w_ag_shr"], params["b_ag_shr"][0])
    t = bnrelu(conv1x1(h, params["w_att"]), params["s_att"][0], params["b_att"][0])
    att = conv1x1(t, params["w_att_shr"], params["b_att_shr"][0])
    Cout = ag.shape[1]
    return (ag.reshape(B, Cout, T, Nv, Nv), att.reshape(B, 1, T, Nv, Nv))


# --------------------------------- main ---------------------------------------
if __name__ == "__main__":
    # Small but grid-friendly shapes: P = B*T*N = 1024 -> tile_p=128, 8 grid steps
    # (>= 4 per TensorCore on v7x megacore).
    B, C, T, Nv = 2, 32, 32, 4
    N = Nv * Nv
    J = 8                    # num_joints for this small test (pos_emb in = 2*J)
    Cout = 16

    key = jax.random.PRNGKey(0)
    kx, kp, kw = jax.random.split(key, 3)
    x = jax.random.normal(kx, (B, C, T, N), jnp.float32)
    pos_2d = jax.random.normal(kp, (B, T, J, 3, Nv), jnp.float32)
    params = make_params(kw, C, Cout, J)

    ag, att = val_forward_pallas(x, pos_2d, params)
    jax.block_until_ready((ag, att))

    ag_ref, att_ref = val_forward_ref(x, pos_2d, params)
    assert ag.shape == (B, Cout, T, Nv, Nv) and att.shape == (B, 1, T, Nv, Nv)
    # bf16 matmul inputs / bf16 activations / bf16 output store vs. pure-f32
    # reference -> relaxed tolerance.
    assert jnp.allclose(ag, ag_ref, atol=8e-2, rtol=8e-2)
    assert jnp.allclose(att, att_ref, atol=8e-2, rtol=8e-2)

    print("KERNEL_OK")
</pallas_src>

<mosaic_0001>
module attributes {stable_mosaic.version = 11 : i64} {
  func.func @_val_kernel(%arg0: i32, %arg1: memref<128x32xbf16, #tpu.memory_space<vmem>>, %arg2: memref<128x16xbf16, #tpu.memory_space<vmem>>, %arg3: memref<16x32xbf16, #tpu.memory_space<vmem>>, %arg4: memref<1x32xf32, #tpu.memory_space<vmem>>, %arg5: memref<32x32xbf16, #tpu.memory_space<vmem>>, %arg6: memref<1x32xf32, #tpu.memory_space<vmem>>, %arg7: memref<32x32xbf16, #tpu.memory_space<vmem>>, %arg8: memref<1x32xf32, #tpu.memory_space<vmem>>, %arg9: memref<32x32xbf16, #tpu.memory_space<vmem>>, %arg10: memref<1x32xf32, #tpu.memory_space<vmem>>, %arg11: memref<32x64xbf16, #tpu.memory_space<vmem>>, %arg12: memref<1x64xf32, #tpu.memory_space<vmem>>, %arg13: memref<64x32xbf16, #tpu.memory_space<vmem>>, %arg14: memref<1x32xf32, #tpu.memory_space<vmem>>, %arg15: memref<128x32xbf16, #tpu.memory_space<vmem>>) attributes {dimension_semantics = [#tpu.dimension_semantics<parallel>], iteration_bounds = array<i64: 8>, scalar_prefetch = 0 : i64, scratch_operands = 0 : i64, tpu.core_type = #tpu.core_type<tc>, window_params = [{transform_indices = @transform_0, window_bounds = array<i64: 128, 32>}, {transform_indices = @transform_1, window_bounds = array<i64: 128, 16>}, {pipeline_mode = #tpu.pipeline_mode<synchronous>, transform_indices = @transform_2, window_bounds = array<i64: 16, 32>}, {pipeline_mode = #tpu.pipeline_mode<synchronous>, transform_indices = @transform_3, window_bounds = array<i64: 1, 32>}, {pipeline_mode = #tpu.pipeline_mode<synchronous>, transform_indices = @transform_4, window_bounds = array<i64: 32, 32>}, {pipeline_mode = #tpu.pipeline_mode<synchronous>, transform_indices = @transform_5, window_bounds = array<i64: 1, 32>}, {pipeline_mode = #tpu.pipeline_mode<synchronous>, transform_indices = @transform_6, window_bounds = array<i64: 32, 32>}, {pipeline_mode = #tpu.pipeline_mode<synchronous>, transform_indices = @transform_7, window_bounds = array<i64: 1, 32>}, {pipeline_mode = #tpu.pipeline_mode<synchronous>, transform_indices = @transform_8, window_bounds = array<i64: 32, 32>}, {pipeline_mode = #tpu.pipeline_mode<synchronous>, transform_indices = @transform_9, window_bounds = array<i64: 1, 32>}, {pipeline_mode = #tpu.pipeline_mode<synchronous>, transform_indices = @transform_10, window_bounds = array<i64: 32, 64>}, {pipeline_mode = #tpu.pipeline_mode<synchronous>, transform_indices = @transform_11, window_bounds = array<i64: 1, 64>}, {pipeline_mode = #tpu.pipeline_mode<synchronous>, transform_indices = @transform_12, window_bounds = array<i64: 64, 32>}, {pipeline_mode = #tpu.pipeline_mode<synchronous>, transform_indices = @transform_13, window_bounds = array<i64: 1, 32>}, {transform_indices = @transform_14, window_bounds = array<i64: 128, 32>}]} {
    %c0 = arith.constant 0 : index
    %c0_0 = arith.constant 0 : index
    %0 = vector.load %arg1[%c0, %c0_0] : memref<128x32xbf16, #tpu.memory_space<vmem>>, vector<128x32xbf16>
    %c0_1 = arith.constant 0 : index
    %c0_2 = arith.constant 0 : index
    %1 = vector.load %arg2[%c0_1, %c0_2] : memref<128x16xbf16, #tpu.memory_space<vmem>>, vector<128x16xbf16>
    %c0_3 = arith.constant 0 : index
    %c0_4 = arith.constant 0 : index
    %2 = vector.load %arg3[%c0_3, %c0_4] : memref<16x32xbf16, #tpu.memory_space<vmem>>, vector<16x32xbf16>
    %cst = arith.constant dense<0.000000e+00> : vector<128x32xf32>
    %3 = tpu.matmul %1, %2, %cst {dimension_numbers = #tpu.dot_dimension_numbers<[1], [0], [0], [1], [0, 0, 1, 1], [], []>} : vector<128x16xbf16>, vector<16x32xbf16>, vector<128x32xf32> -> vector<128x32xf32>
    %c0_5 = arith.constant 0 : index
    %c0_6 = arith.constant 0 : index
    %4 = vector.load %arg4[%c0_5, %c0_6] : memref<1x32xf32, #tpu.memory_space<vmem>>, vector<1x32xf32>
    %5 = vector.broadcast %4 : vector<1x32xf32> to vector<128x32xf32>
    %6 = arith.addf %3, %5 : vector<128x32xf32>
    %c0_7 = arith.constant 0 : index
    %c0_8 = arith.constant 0 : index
    %7 = vector.load %arg5[%c0_7, %c0_8] : memref<32x32xbf16, #tpu.memory_space<vmem>>, vector<32x32xbf16>
    %cst_9 = arith.constant dense<0.000000e+00> : vector<128x32xf32>
    %8 = tpu.matmul %0, %7, %cst_9 {dimension_numbers = #tpu.dot_dimension_numbers<[1], [0], [0], [1], [0, 0, 1, 1], [], []>} : vector<128x32xbf16>, vector<32x32xbf16>, vector<128x32xf32> -> vector<128x32xf32>
    %c0_10 = arith.constant 0 : index
    %c0_11 = arith.constant 0 : index
    %9 = vector.load %arg6[%c0_10, %c0_11] : memref<1x32xf32, #tpu.memory_space<vmem>>, vector<1x32xf32>
    %10 = vector.broadcast %9 : vector<1x32xf32> to vector<128x32xf32>
    %11 = arith.addf %8, %10 : vector<128x32xf32>
    %cst_12 = arith.constant 0.000000e+00 : f32
    %12 = vector.broadcast %cst_12 : f32 to vector<128x32xf32>
    %13 = arith.maximumf %11, %12 : vector<128x32xf32>
    %14 = arith.addf %13, %6 : vector<128x32xf32>
    %15 = arith.truncf %14 : vector<128x32xf32> to vector<128x32xbf16>
    %c0_13 = arith.constant 0 : index
    %c0_14 = arith.constant 0 : index
    %16 = vector.load %arg7[%c0_13, %c0_14] : memref<32x32xbf16, #tpu.memory_space<vmem>>, vector<32x32xbf16>
    %cst_15 = arith.constant dense<0.000000e+00> : vector<128x32xf32>
    %17 = tpu.matmul %15, %16, %cst_15 {dimension_numbers = #tpu.dot_dimension_numbers<[1], [0], [0], [1], [0, 0, 1, 1], [], []>} : vector<128x32xbf16>, vector<32x32xbf16>, vector<128x32xf32> -> vector<128x32xf32>
    %c0_16 = arith.constant 0 : index
    %c0_17 = arith.constant 0 : index
    %18 = vector.load %arg8[%c0_16, %c0_17] : memref<1x32xf32, #tpu.memory_space<vmem>>, vector<1x32xf32>
    %19 = vector.broadcast %18 : vector<1x32xf32> to vector<128x32xf32>
    %20 = arith.addf %17, %19 : vector<128x32xf32>
    %cst_18 = arith.constant 0.000000e+00 : f32
    %21 = vector.broadcast %cst_18 : f32 to vector<128x32xf32>
    %22 = arith.maximumf %20, %21 : vector<128x32xf32>
    %23 = arith.truncf %22 : vector<128x32xf32> to vector<128x32xbf16>
    %c0_19 = arith.constant 0 : index
    %c0_20 = arith.constant 0 : index
    %24 = vector.load %arg9[%c0_19, %c0_20] : memref<32x32xbf16, #tpu.memory_space<vmem>>, vector<32x32xbf16>
    %cst_21 = arith.constant dense<0.000000e+00> : vector<128x32xf32>
    %25 = tpu.matmul %23, %24, %cst_21 {dimension_numbers = #tpu.dot_dimension_numbers<[1], [0], [0], [1], [0, 0, 1, 1], [], []>} : vector<128x32xbf16>, vector<32x32xbf16>, vector<128x32xf32> -> vector<128x32xf32>
    %c0_22 = arith.constant 0 : index
    %c0_23 = arith.constant 0 : index
    %26 = vector.load %arg10[%c0_22, %c0_23] : memref<1x32xf32, #tpu.memory_space<vmem>>, vector<1x32xf32>
    %27 = vector.broadcast %26 : vector<1x32xf32> to vector<128x32xf32>
    %28 = arith.addf %25, %27 : vector<128x32xf32>
    %cst_24 = arith.constant 0.000000e+00 : f32
    %29 = vector.broadcast %cst_24 : f32 to vector<128x32xf32>
    %30 = arith.maximumf %28, %29 : vector<128x32xf32>
    %31 = arith.truncf %30 : vector<128x32xf32> to vector<128x32xbf16>
    %32 = arith.addf %15, %31 : vector<128x32xbf16>
    %c0_25 = arith.constant 0 : index
    %c0_26 = arith.constant 0 : index
    %33 = vector.load %arg11[%c0_25, %c0_26] : memref<32x64xbf16, #tpu.memory_space<vmem>>, vector<32x64xbf16>
    %cst_27 = arith.constant dense<0.000000e+00> : vector<128x64xf32>
    %34 = tpu.matmul %32, %33, %cst_27 {dimension_numbers = #tpu.dot_dimension_numbers<[1], [0], [0], [1], [0, 0, 1, 1], [], []>} : vector<128x32xbf16>, vector<32x64xbf16>, vector<128x64xf32> -> vector<128x64xf32>
    %c0_28 = arith.constant 0 : index
    %c0_29 = arith.constant 0 : index
    %35 = vector.load %arg12[%c0_28, %c0_29] : memref<1x64xf32, #tpu.memory_space<vmem>>, vector<1x64xf32>
    %36 = vector.broadcast %35 : vector<1x64xf32> to vector<128x64xf32>
    %37 = arith.addf %34, %36 : vector<128x64xf32>
    %cst_30 = arith.constant 0.000000e+00 : f32
    %38 = vector.broadcast %cst_30 : f32 to vector<128x64xf32>
    %39 = arith.maximumf %37, %38 : vector<128x64xf32>
    %40 = arith.truncf %39 : vector<128x64xf32> to vector<128x64xbf16>
    %c0_31 = arith.constant 0 : index
    %c0_32 = arith.constant 0 : index
    %41 = vector.load %arg13[%c0_31, %c0_32] : memref<64x32xbf16, #tpu.memory_space<vmem>>, vector<64x32xbf16>
    %cst_33 = arith.constant dense<0.000000e+00> : vector<128x32xf32>
    %42 = tpu.matmul %40, %41, %cst_33 {dimension_numbers = #tpu.dot_dimension_numbers<[1], [0], [0], [1], [0, 0, 1, 1], [], []>} : vector<128x64xbf16>, vector<64x32xbf16>, vector<128x32xf32> -> vector<128x32xf32>
    %c0_34 = arith.constant 0 : index
    %c0_35 = arith.constant 0 : index
    %43 = vector.load %arg14[%c0_34, %c0_35] : memref<1x32xf32, #tpu.memory_space<vmem>>, vector<1x32xf32>
    %44 = vector.broadcast %43 : vector<1x32xf32> to vector<128x32xf32>
    %45 = arith.addf %42, %44 : vector<128x32xf32>
    %46 = arith.truncf %45 : vector<128x32xf32> to vector<128x32xbf16>
    %c0_36 = arith.constant 0 : index
    %c0_37 = arith.constant 0 : index
    %47 = vector.load %arg15[%c0_36, %c0_37] : memref<128x32xbf16, #tpu.memory_space<vmem>>, vector<128x32xbf16>
    tpu.vector_store %arg15[%c0_36, %c0_37], %46 {strides = array<i32>} : memref<128x32xbf16, #tpu.memory_space<vmem>>, vector<128x32xbf16>,
    return
  }
  func.func @transform_0(%arg0: i32) -> (i32, i32) {
    %c0_i32 = arith.constant 0 : i32
    %c0_i32_0 = arith.constant 0 : i32
    return %arg0, %c0_i32 : i32, i32
  }
  func.func @transform_1(%arg0: i32) -> (i32, i32) {
    %c0_i32 = arith.constant 0 : i32
    %c0_i32_0 = arith.constant 0 : i32
    return %arg0, %c0_i32 : i32, i32
  }
  func.func @transform_2(%arg0: i32) -> (i32, i32) {
    %c0_i32 = arith.constant 0 : i32
    %c0_i32_0 = arith.constant 0 : i32
    %c0_i32_1 = arith.constant 0 : i32
    return %c0_i32, %c0_i32_0 : i32, i32
  }
  func.func @transform_3(%arg0: i32) -> (i32, i32) {
    %c0_i32 = arith.constant 0 : i32
    %c0_i32_0 = arith.constant 0 : i32
    %c0_i32_1 = arith.constant 0 : i32
    return %c0_i32, %c0_i32_0 : i32, i32
  }
  func.func @transform_4(%arg0: i32) -> (i32, i32) {
    %c0_i32 = arith.constant 0 : i32
    %c0_i32_0 = arith.constant 0 : i32
    %c0_i32_1 = arith.constant 0 : i32
    return %c0_i32, %c0_i32_0 : i32, i32
  }
  func.func @transform_5(%arg0: i32) -> (i32, i32) {
    %c0_i32 = arith.constant 0 : i32
    %c0_i32_0 = arith.constant 0 : i32
    %c0_i32_1 = arith.constant 0 : i32
    return %c0_i32, %c0_i32_0 : i32, i32
  }
  func.func @transform_6(%arg0: i32) -> (i32, i32) {
    %c0_i32 = arith.constant 0 : i32
    %c0_i32_0 = arith.constant 0 : i32
    %c0_i32_1 = arith.constant 0 : i32
    return %c0_i32, %c0_i32_0 : i32, i32
  }
  func.func @transform_7(%arg0: i32) -> (i32, i32) {
    %c0_i32 = arith.constant 0 : i32
    %c0_i32_0 = arith.constant 0 : i32
    %c0_i32_1 = arith.constant 0 : i32
    return %c0_i32, %c0_i32_0 : i32, i32
  }
  func.func @transform_8(%arg0: i32) -> (i32, i32) {
    %c0_i32 = arith.constant 0 : i32
    %c0_i32_0 = arith.constant 0 : i32
    %c0_i32_1 = arith.constant 0 : i32
    return %c0_i32, %c0_i32_0 : i32, i32
  }
  func.func @transform_9(%arg0: i32) -> (i32, i32) {
    %c0_i32 = arith.constant 0 : i32
    %c0_i32_0 = arith.constant 0 : i32
    %c0_i32_1 = arith.constant 0 : i32
    return %c0_i32, %c0_i32_0 : i32, i32
  }
  func.func @transform_10(%arg0: i32) -> (i32, i32) {
    %c0_i32 = arith.constant 0 : i32
    %c0_i32_0 = arith.constant 0 : i32
    %c0_i32_1 = arith.constant 0 : i32
    return %c0_i32, %c0_i32_0 : i32, i32
  }
  func.func @transform_11(%arg0: i32) -> (i32, i32) {
    %c0_i32 = arith.constant 0 : i32
    %c0_i32_0 = arith.constant 0 : i32
    %c0_i32_1 = arith.constant 0 : i32
    return %c0_i32, %c0_i32_0 : i32, i32
  }
  func.func @transform_12(%arg0: i32) -> (i32, i32) {
    %c0_i32 = arith.constant 0 : i32
    %c0_i32_0 = arith.constant 0 : i32
    %c0_i32_1 = arith.constant 0 : i32
    return %c0_i32, %c0_i32_0 : i32, i32
  }
  func.func @transform_13(%arg0: i32) -> (i32, i32) {
    %c0_i32 = arith.constant 0 : i32
    %c0_i32_0 = arith.constant 0 : i32
    %c0_i32_1 = arith.constant 0 : i32
    return %c0_i32, %c0_i32_0 : i32, i32
  }
  func.func @transform_14(%arg0: i32) -> (i32, i32) {
    %c0_i32 = arith.constant 0 : i32
    %c0_i32_0 = arith.constant 0 : i32
    return %arg0, %c0_i32 : i32, i32
  }
}

</mosaic_0001>

<bundles_post_ra>
// kernel: tpu_custom_call.1
= control target key start
LH: loop header
LB: loop body
LE: loop exit
PB: predicated region body
PF: predicated region fallthrough
CT: control target
= control target key end

     0   :  { %s2181_s29 = smov 0   ;;  %s2433_s0 = inlined_call_operand.vmem [shape: bf16[1024,32], index: 0, kind: input, shape index: {}]   ;;  %s2434_s1 = inlined_call_operand.vmem [shape: bf16[1024,16], index: 1, kind: input, shape index: {}]   ;;  %s2435_s2 = inlined_call_operand.vmem [shape: bf16[16,32], index: 2, kind: input, shape index: {}]   ;;  %s2436_s3 = inlined_call_operand.vmem [shape: f32[1,32], index: 3, kind: input, shape index: {}]   ;;  %s2437_s4 = inlined_call_operand.vmem [shape: bf16[32,32], index: 4, kind: input, shape index: {}]   ;;  %s2438_s5 = inlined_call_operand.vmem [shape: f32[1,32], index: 5, kind: input, shape index: {}]   ;;  %s2439_s6 = inlined_call_operand.vmem [shape: bf16[32,32], index: 6, kind: input, shape index: {}]   ;;  %s2440_s7 = inlined_call_operand.vmem [shape: f32[1,32], index: 7, kind: input, shape index: {}]   ;;  %s2441_s8 = inlined_call_operand.vmem [shape: bf16[32,32], index: 8, kind: input, shape index: {}]   ;;  %s2442_s9 = inlined_call_operand.vmem [shape: f32[1,32], index: 9, kind: input, shape index: {}]   ;;  %s2443_s10 = inlined_call_operand.vmem [shape: bf16[32,64], index: 10, kind: input, shape index: {}]   ;;  %s2444_s11 = inlined_call_operand.vmem [shape: f32[1,64], index: 11, kind: input, shape index: {}]   ;;  %s2445_s12 = inlined_call_operand.vmem [shape: bf16[64,32], index: 12, kind: input, shape index: {}]   ;;  %s2446_s13 = inlined_call_operand.vmem [shape: f32[1,32], index: 13, kind: input, shape index: {}]   ;;  %s2447_s14 = inlined_call_operand.vmem [shape: bf16[1024,32], index: 14, kind: output, shape index: {}]  }
   0x1 LB: > { %s1750_s30 = sadd.s32 4294967295, %s2104_s29   ;;  %p1754_p0 = scmp.ge.s32.totalorder %s2104_s29, 1  ;;  %s2104_s29 = sphi %s2181_s29, %s24_s29  }
   0x2   : > { %p424_p1 = scmp.lt.s32.totalorder %s2104_s29, 9 }
   0x4   : > { %p425_p2 = pnand %p1754_p0, %p424_p1 }
   0x5   : > { %v2069_v0 = vld [vmem:[%s2437_s4] sm:$0xff] (!%p425_p2)   ;;  %s1755_s17 = sshll.u32 (!%p425_p2), %s1750_s30, 4  ;;  %v2071_v2 = vld [vmem:[%s2437_s4 + $0x8] sm:$0xff] (!%p425_p2)   ;;  %vm581_vm0 = vcmask (!%p425_p2), 130048   ;;  %vm766_vm1 = vcmask (!%p425_p2), 261120   ;;  %vm1479_vm2 = vcmask (!%p425_p2), 523264  }
   0x6   : > { %428 = sbr.rel (%p425_p2) target bundleno = 1155 (0x483), region = 76  ;;  %v2070_v1 = vld [vmem:[%s2435_s2] sm:$0xff] (!%p425_p2)   ;;  %p476_p3 = scmp.lt.s32.totalorder (!%p425_p2), %s1755_s17, 127  ;;  %1957 = vmatprep.subr.bf16.mxu1 (!%p425_p2), %v2069_v0  ;;  %v2089_v5 = vld [vmem:[%s2439_s6 + $0x8] sm:$0xff] (!%p425_p2)   ;;  %vm1665_vm3 = vcmask (!%p425_p2), 257024  }
   0x7   : > { %1958 = vmatpush3.bf16.msra.mxu1 (!%p425_p2), %v2069_v0  ;;  %1939 = vmatprep.subr.bf16.mxu0 (!%p425_p2), %v2070_v1  ;;  %v2088_v3 = vld [vmem:[%s2439_s6] sm:$0xff] (!%p425_p2)   ;;  %v2091_v22 = vld [vmem:[%s2441_s8 + $0x8] sm:$0xff] (!%p425_p2)  }
   0x8   : > { %1959 = vmatprep.subr.bf16.mxu1 (!%p425_p2), %v2071_v2  ;;  %1940 = vmatpush3.bf16.msra.mxu0 (!%p425_p2), %v2070_v1  ;;  %v2090_v21 = vld [vmem:[%s2441_s8] sm:$0xff] (!%p425_p2)  }
   0x9   : > { %1977 = vmatprep.subr.bf16.mxu0 (!%p425_p2), %v2088_v3  ;;  %v2259_v23 = vld [vmem:[%s2436_s3] ss:$0 sm:$0xff] (!%p425_p2) }
   0xa   : > { %v2264_v24 = vld [vmem:[%s2438_s5] ss:$0 sm:$0xff] (!%p425_p2) }
   0xb   : > { %1960 = vmatpush3.bf16.msra.mxu1 (!%p425_p2), %v2071_v2 }
   0xc   : > { %1997 = vmatprep.subr.bf16.mxu1 (!%p425_p2), %v2090_v21 }
   0xd   : > { %s2449_s17 = smov (!%p476_p3, %s1755_s17), 127 }
   0xe   : > { %s2201_s24 = sshll.u32 %s2449_s17, 2 }
   0xf   : > { %s2207_s27 = scalar_lea.vmem %s2434_s1, %s2201_s24  ;;  %s2213_s15 = scalar_lea.vmem %s2433_s0, %s2201_s24 }
  0x10   : > { %v2072_v4 = vld [vmem:[%s2207_s27] sm:$0xff]   ;;  %v2074_v7 = vld [vmem:[%s2207_s27 + $0x8] sm:$0xff]   ;;  %v2076_v9 = vld [vmem:[%s2207_s27 + $0x10] sm:$0xff]   ;;  %s2396_s20 = scalar_lea.vmem %s2447_s14, %s2201_s24 }
  0x11   : > { %v2073_v6 = vld [vmem:[%s2213_s15] sm:$0xff]   ;;  %1941 = vmatprep.mubr.msk.bf16.mxu0 %vm581_vm0, %v2072_v4  ;;  %v2075_v8 = vld [vmem:[%s2213_s15 + $0x8] sm:$0xff]   ;;  %v2077_v10 = vld [vmem:[%s2213_s15 + $0x10] sm:$0xff]  }
  0x12   : > { %1961 = vmatprep.mubr.msk.bf16.mxu1 %vm766_vm1, %v2073_v6  ;;  %1942 = vmatmul.mubr.msk.bf16.vlgmr.msra.gmra.mrb[0].mxu0 %vm581_vm0, %v2074_v7  ;;  %v2078_v11 = vld [vmem:[%s2207_s27 + $0x18] sm:$0xff]   ;;  %v2080_v13 = vld [vmem:[%s2207_s27 + $0x20] sm:$0xff]   ;;  %v2082_v15 = vld [vmem:[%s2207_s27 + $0x28] sm:$0xff]  }
  0x13   : > { %1962 = vmatmul.mubr.msk.bf16.vlgmr.msra.gmra.mrb[0].mxu1 %vm766_vm1, %v2075_v8  ;;  %1978 = vmatpush3.bf16.msra.mxu0 %v2088_v3  ;;  %v2079_v12 = vld [vmem:[%s2213_s15 + $0x18] sm:$0xff]   ;;  %v2081_v14 = vld [vmem:[%s2213_s15 + $0x20] sm:$0xff]   ;;  %v2083_v16 = vld [vmem:[%s2213_s15 + $0x28] sm:$0xff]  }
  0x14   : > { %1945 = vmatprep.mubr.msk.bf16.mxu0 %vm581_vm0, %v2076_v9  ;;  %1979 = vmatprep.subr.bf16.mxu0 %v2089_v5  ;;  %v2084_v17 = vld [vmem:[%s2207_s27 + $0x30] sm:$0xff]   ;;  %v2086_v19 = vld [vmem:[%s2207_s27 + $0x38] sm:$0xff]  }
  0x15   : > { %1965 = vmatprep.mubr.msk.bf16.mxu1 %vm766_vm1, %v2077_v10  ;;  %v2085_v18 = vld [vmem:[%s2213_s15 + $0x30] sm:$0xff]   ;;  %v2087_v20 = vld [vmem:[%s2213_s15 + $0x38] sm:$0xff]   ;;  %1998 = vmatpush3.bf16.msra.mxu1 %v2090_v21 }
  0x16   : > { %1999 = vmatprep.subr.bf16.mxu1 %v2091_v22 }
  0x17   : > { %1980 = vmatpush3.bf16.msra.mxu0 %v2089_v5 }
  0x19   : > { %2000 = vmatpush3.bf16.msra.mxu1 %v2091_v22 }
  0x1a   : > { %1946 = vmatmul.mubr.msk.bf16.gmra.mrb[4].mxu0 %vm581_vm0, %v2078_v11 }
  0x1b   : > { %1966 = vmatmul.mubr.msk.bf16.gmra.mrb[4].mxu1 %vm766_vm1, %v2079_v12  ;;  %1949 = vmatprep.mubr.msk.bf16.mxu0 %vm581_vm0, %v2080_v13 }
  0x1c   : > { %1969 = vmatprep.mubr.msk.bf16.mxu1 %vm766_vm1, %v2081_v14 }
  0x22   : > { %1950 = vmatmul.mubr.msk.bf16.gmra.mrb[8].mxu0 %vm581_vm0, %v2082_v15 }
  0x23   : > { %1970 = vmatmul.mubr.msk.bf16.gmra.mrb[8].mxu1 %vm766_vm1, %v2083_v16  ;;  %1953 = vmatprep.mubr.msk.bf16.mxu0 %vm581_vm0, %v2084_v17 }
  0x24   : > { %1973 = vmatprep.mubr.msk.bf16.mxu1 %vm766_vm1, %v2085_v18 }
  0x2a   : > { %1954 = vmatmul.mubr.msk.bf16.gmra.mrb[12].mxu0 %vm581_vm0, %v2086_v19 }
  0x2b   : > { %1974 = vmatmul.mubr.msk.bf16.gmra.mrb[12].mxu1 %vm766_vm1, %v2087_v20 }
  0xe5   : > { %v1943_v25 = vpop.f32.mrb[0].mxu0 }
  0xe6   : > { %v1963_v26 = vpop.f32.mrb[0].mxu1  ;;  %v640_v27 = vpop.f32.mrb[1].mxu0  ;;  %v649_v28 = vadd.f32 %v1943_v25, %v2259_v23 }
  0xe7   : > { %v834_v29 = vadd.f32 %v1963_v26, %v2264_v24  ;;  %v825_v30 = vpop.f32.mrb[1].mxu1  ;;  %v1944_v31 = vpop.f32.mrb[2].mxu0  ;;  %v641_v32 = vadd.f32 %v2259_v23, %v640_v27 }
  0xe8   : > { %v826_v33 = vadd.f32 %v2264_v24, %v825_v30  ;;  %v1964_v34 = vpop.f32.mrb[2].mxu1  ;;  %v643_v35 = vpop.f32.mrb[3].mxu0  ;;  %v652_v42 = vadd.f32 %v1944_v31, %v2259_v23 }
  0xe9   : > { %v890_v36 = vmax.f32 %v834_v29, 0.0  ;;  %v837_v37 = vadd.f32 %v1964_v34, %v2264_v24  ;;  %v828_v38 = vpop.f32.mrb[3].mxu1  ;;  %v644_v45 = vadd.f32 %v2259_v23, %v643_v35 }
  0xea   : > { %v888_v39 = vmax.f32 %v826_v33, 0.0  ;;  %v829_v40 = vadd.f32 %v2264_v24, %v828_v38 }
  0xeb   : > { %v906_v41 = vadd.f32 %v890_v36, %v649_v28  ;;  %v891_v43 = vmax.f32 %v837_v37, 0.0 }
  0xec   : > { %v904_v44 = vadd.f32 %v888_v39, %v641_v32  ;;  %v889_v46 = vmax.f32 %v829_v40, 0.0 }
  0xed   : > { %v907_v47 = vadd.f32 %v891_v43, %v652_v42  ;;  %v1947_v48 = vpop.f32.mrb[4].mxu0 }
  0xee   : > { %v905_v49 = vadd.f32 %v889_v46, %v644_v45  ;;  %v1967_v50 = vpop.f32.mrb[4].mxu1  ;;  %v656_v51 = vpop.f32.mrb[5].mxu0  ;;  %v665_v53 = vadd.f32 %v1947_v48, %v2259_v23 }
  0xef   : > { %v2274_v52 = vpack.c.bf16 %v907_v47, %v906_v41  ;;  %v850_v54 = vadd.f32 %v1967_v50, %v2264_v24  ;;  %v841_v55 = vpop.f32.mrb[5].mxu1  ;;  %v1948_v56 = vpop.f32.mrb[6].mxu0  ;;  %v657_v58 = vadd.f32 %v2259_v23, %v656_v51 }
  0xf0   : > { %v2278_v57 = vpack.c.bf16 %v905_v49, %v904_v44  ;;  %v842_v59 = vadd.f32 %v2264_v24, %v841_v55  ;;  %v1968_v60 = vpop.f32.mrb[6].mxu1  ;;  %v659_v61 = vpop.f32.mrb[7].mxu0  ;;  %v668_v4 = vadd.f32 %v1948_v56, %v2259_v23 }
  0xf1   : > { %v894_v62 = vmax.f32 %v850_v54, 0.0  ;;  %v853_v63 = vadd.f32 %v1968_v60, %v2264_v24  ;;  %v844_v0 = vpop.f32.mrb[7].mxu1  ;;  %v660_v7 = vadd.f32 %v2259_v23, %v659_v61 }
  0xf2   : > { %v892_v1 = vmax.f32 %v842_v59, 0.0  ;;  %v845_v2 = vadd.f32 %v2264_v24, %v844_v0  ;;  %1981 = vmatprep.mubr.msk.bf16.mxu0 %vm766_vm1, %v2278_v57 }
  0xf3   : > { %v910_v3 = vadd.f32 %v894_v62, %v665_v53  ;;  %v895_v5 = vmax.f32 %v853_v63, 0.0  ;;  %1982 = vmatmul.mubr.msk.bf16.vlgmr.msra.gmra.mrb[16].mxu0 %vm766_vm1, %v2274_v52 }
  0xf4   : > { %v908_v6 = vadd.f32 %v892_v1, %v657_v58  ;;  %v893_v8 = vmax.f32 %v845_v2, 0.0 }
  0xf5   : > { %v911_v9 = vadd.f32 %v895_v5, %v668_v4  ;;  %v1951_v10 = vpop.f32.mrb[8].mxu0  ;;  %v1798_v5 = vld [vmem:[%s2440_s7] ss:$0 sm:$0xff] }
  0xf6   : > { %v909_v11 = vadd.f32 %v893_v8, %v660_v7  ;;  %v1971_v12 = vpop.f32.mrb[8].mxu1  ;;  %v672_v13 = vpop.f32.mrb[9].mxu0  ;;  %v681_v15 = vadd.f32 %v1951_v10, %v2259_v23 }
  0xf7   : > { %v2290_v14 = vpack.c.bf16 %v911_v9, %v910_v3  ;;  %v866_v16 = vadd.f32 %v1971_v12, %v2264_v24  ;;  %v857_v17 = vpop.f32.mrb[9].mxu1  ;;  %v1952_v18 = vpop.f32.mrb[10].mxu0  ;;  %v673_v20 = vadd.f32 %v2259_v23, %v672_v13 }
  0xf8   : > { %v2294_v19 = vpack.c.bf16 %v909_v11, %v908_v6  ;;  %v858_v21 = vadd.f32 %v2264_v24, %v857_v17  ;;  %v1972_v22 = vpop.f32.mrb[10].mxu1  ;;  %v675_v25 = vpop.f32.mrb[11].mxu0  ;;  %v684_v32 = vadd.f32 %v1952_v18, %v2259_v23 }
  0xf9   : > { %v898_v26 = vmax.f32 %v866_v16, 0.0  ;;  %v869_v27 = vadd.f32 %v1972_v22, %v2264_v24  ;;  %v860_v28 = vpop.f32.mrb[11].mxu1  ;;  %v676_v35 = vadd.f32 %v2259_v23, %v675_v25 }
  0xfa   : > { %v896_v29 = vmax.f32 %v858_v21, 0.0  ;;  %v861_v30 = vadd.f32 %v2264_v24, %v860_v28  ;;  %1985 = vmatprep.mubr.msk.bf16.mxu0 %vm766_vm1, %v2294_v19 }
  0xfb   : > { %v914_v31 = vadd.f32 %v898_v26, %v681_v15  ;;  %v899_v33 = vmax.f32 %v869_v27, 0.0  ;;  %1986 = vmatmul.mubr.msk.bf16.gmra.mrb[20].mxu0 %vm766_vm1, %v2290_v14 }
  0xfc   : > { %v912_v34 = vadd.f32 %v896_v29, %v673_v20  ;;  %v897_v36 = vmax.f32 %v861_v30, 0.0 }
  0xfd   : > { %v915_v37 = vadd.f32 %v899_v33, %v684_v32  ;;  %v1955_v38 = vpop.f32.mrb[12].mxu0 }
  0xfe   : > { %v913_v39 = vadd.f32 %v897_v36, %v676_v35  ;;  %v1975_v40 = vpop.f32.mrb[12].mxu1  ;;  %v688_v41 = vpop.f32.mrb[13].mxu0  ;;  %v697_v43 = vadd.f32 %v1955_v38, %v2259_v23 }
  0xff   : > { %v2306_v42 = vpack.c.bf16 %v915_v37, %v914_v31  ;;  %v882_v44 = vadd.f32 %v1975_v40, %v2264_v24  ;;  %v873_v45 = vpop.f32.mrb[13].mxu1  ;;  %v1956_v46 = vpop.f32.mrb[14].mxu0  ;;  %v689_v48 = vadd.f32 %v2259_v23, %v688_v41 }
 0x100   : > { %v2310_v47 = vpack.c.bf16 %v913_v39, %v912_v34  ;;  %v874_v49 = vadd.f32 %v2264_v24, %v873_v45  ;;  %v1976_v50 = vpop.f32.mrb[14].mxu1  ;;  %v691_v51 = vpop.f32.mrb[15].mxu0  ;;  %v700_v60 = vadd.f32 %v1956_v46, %v2259_v23 }
 0x101   : > { %v902_v53 = vmax.f32 %v882_v44, 0.0  ;;  %v885_v54 = vadd.f32 %v1976_v50, %v2264_v24  ;;  %v876_v55 = vpop.f32.mrb[15].mxu1  ;;  %v692_v63 = vadd.f32 %v2259_v23, %v691_v51  ;;  %v2093_v23 = vld [vmem:[%s2443_s10 + $0x8] sm:$0xff]  }
 0x102   : > { %v900_v56 = vmax.f32 %v874_v49, 0.0  ;;  %v877_v58 = vadd.f32 %v2264_v24, %v876_v55  ;;  %1989 = vmatprep.mubr.msk.bf16.mxu0 %vm766_vm1, %v2310_v47  ;;  %v2092_v24 = vld [vmem:[%s2443_s10] sm:$0xff]  }
 0x103   : > { %v918_v59 = vadd.f32 %v902_v53, %v697_v43  ;;  %v903_v61 = vmax.f32 %v885_v54, 0.0  ;;  %1990 = vmatmul.mubr.msk.bf16.gmra.mrb[24].mxu0 %vm766_vm1, %v2306_v42  ;;  %2017 = vmatprep.subr.bf16.mxu0 %v2092_v24 }
 0x104   : > { %v916_v62 = vadd.f32 %v900_v56, %v689_v48  ;;  %v901_v0 = vmax.f32 %v877_v58, 0.0  ;;  %2018 = vmatpush3.bf16.msra.mxu0 %v2092_v24 }
 0x105   : > { %v919_v1 = vadd.f32 %v903_v61, %v700_v60  ;;  %2019 = vmatprep.subr.bf16.mxu0 %v2093_v23 }
 0x106   : > { %v917_v2 = vadd.f32 %v901_v0, %v692_v63 }
 0x107   : > { %v2322_v3 = vpack.c.bf16 %v919_v1, %v918_v59 }
 0x108   : > { %v2324_v4 = vpack.c.bf16 %v917_v2, %v916_v62  ;;  %2020 = vmatpush3.bf16.msra.mxu0 %v2093_v23 }
 0x10a   : > { %1993 = vmatprep.mubr.msk.bf16.mxu0 %vm766_vm1, %v2324_v4 }
 0x10b   : > { %1994 = vmatmul.mubr.msk.bf16.gmra.mrb[28].mxu0 %vm766_vm1, %v2322_v3 }
 0x1c6   : > { %v1983_v6 = vpop.f32.mrb[16].mxu0 }
 0x1c7   : > { %v1018_v7 = vadd.f32 %v1983_v6, %v1798_v5  ;;  %v1009_v8 = vpop.f32.mrb[17].mxu0 }
 0x1c8   : > { %v1010_v9 = vadd.f32 %v1798_v5, %v1009_v8  ;;  %v1984_v10 = vpop.f32.mrb[18].mxu0  ;;  %v2095_v8 = vld [vmem:[%s2445_s12 + $0x8] sm:$0xff]  }
 0x1c9   : > { %v1021_v11 = vadd.f32 %v1984_v10, %v1798_v5  ;;  %v1012_v12 = vpop.f32.mrb[19].mxu0  ;;  %v1074_v15 = vmax.f32 %v1018_v7, 0.0  ;;  %v2094_v7 = vld [vmem:[%s2445_s12] sm:$0xff]  }
 0x1ca   : > { %v1013_v13 = vadd.f32 %v1798_v5, %v1012_v12  ;;  %v1072_v17 = vmax.f32 %v1010_v9, 0.0  ;;  %2037 = vmatprep.subr.bf16.mxu1 %v2094_v7  ;;  %v1809_v9 = vld [vmem:[%s2442_s9] ss:$0 sm:$0xff] }
 0x1cb   : > { %v1075_v16 = vmax.f32 %v1021_v11, 0.0 }
 0x1cc   : > { %v1073_v18 = vmax.f32 %v1013_v13, 0.0 }
 0x1cd   : > { %v1089_v20 = vpack.c.bf16 %v1075_v16, %v1074_v15 }
 0x1ce   : > { %v1088_v21 = vpack.c.bf16 %v1073_v18, %v1072_v17  ;;  %v1987_v22 = vpop.f32.mrb[20].mxu0 }
 0x1cf   : > { %v1034_v25 = vadd.f32 %v1987_v22, %v1798_v5  ;;  %v1025_v26 = vpop.f32.mrb[21].mxu0 }
 0x1d0   : > { %v1026_v27 = vadd.f32 %v1798_v5, %v1025_v26  ;;  %v1988_v28 = vpop.f32.mrb[22].mxu0  ;;  %2001 = vmatprep.mubr.msk.bf16.mxu1 %vm766_vm1, %v1088_v21 }
 0x1d1   : > { %v1037_v29 = vadd.f32 %v1988_v28, %v1798_v5  ;;  %v1028_v30 = vpop.f32.mrb[23].mxu0  ;;  %2002 = vmatmul.mubr.msk.bf16.vlgmr.msra.gmra.mrb[16].mxu1 %vm766_vm1, %v1089_v20  ;;  %v1078_v32 = vmax.f32 %v1034_v25, 0.0 }
 0x1d2   : > { %v1029_v31 = vadd.f32 %v1798_v5, %v1028_v30  ;;  %v1076_v34 = vmax.f32 %v1026_v27, 0.0  ;;  %2038 = vmatpush3.bf16.msra.mxu1 %v2094_v7 }
 0x1d3   : > { %v1079_v33 = vmax.f32 %v1037_v29, 0.0  ;;  %2039 = vmatprep.subr.bf16.mxu1 %v2095_v8 }
 0x1d4   : > { %v1077_v35 = vmax.f32 %v1029_v31, 0.0 }
 0x1d5   : > { %v1091_v36 = vpack.c.bf16 %v1079_v33, %v1078_v32 }
 0x1d6   : > { %v1090_v37 = vpack.c.bf16 %v1077_v35, %v1076_v34  ;;  %v1991_v38 = vpop.f32.mrb[24].mxu0  ;;  %2040 = vmatpush3.bf16.msra.mxu1 %v2095_v8 }
 0x1d7   : > { %v1050_v39 = vadd.f32 %v1991_v38, %v1798_v5  ;;  %v1041_v40 = vpop.f32.mrb[25].mxu0 }
 0x1d8   : > { %v1042_v41 = vadd.f32 %v1798_v5, %v1041_v40  ;;  %v1992_v43 = vpop.f32.mrb[26].mxu0  ;;  %2005 = vmatprep.mubr.msk.bf16.mxu1 %vm766_vm1, %v1090_v37 }
 0x1d9   : > { %v1053_v44 = vadd.f32 %v1992_v43, %v1798_v5  ;;  %v1044_v45 = vpop.f32.mrb[27].mxu0  ;;  %2006 = vmatmul.mubr.msk.bf16.gmra.mrb[20].mxu1 %vm766_vm1, %v1091_v36  ;;  %v1082_v48 = vmax.f32 %v1050_v39, 0.0 }
 0x1da   : > { %v1045_v46 = vadd.f32 %v1798_v5, %v1044_v45  ;;  %v1080_v50 = vmax.f32 %v1042_v41, 0.0 }
 0x1db   : > { %v1083_v49 = vmax.f32 %v1053_v44, 0.0 }
 0x1dc   : > { %v1081_v51 = vmax.f32 %v1045_v46, 0.0 }
 0x1dd   : > { %v1093_v53 = vpack.c.bf16 %v1083_v49, %v1082_v48 }
 0x1de   : > { %v1092_v54 = vpack.c.bf16 %v1081_v51, %v1080_v50  ;;  %v1995_v55 = vpop.f32.mrb[28].mxu0 }
 0x1df   : > { %v1066_v56 = vadd.f32 %v1995_v55, %v1798_v5  ;;  %v1057_v58 = vpop.f32.mrb[29].mxu0 }
 0x1e0   : > { %v1058_v59 = vadd.f32 %v1798_v5, %v1057_v58  ;;  %v1996_v60 = vpop.f32.mrb[30].mxu0  ;;  %2009 = vmatprep.mubr.msk.bf16.mxu1 %vm766_vm1, %v1092_v54 }
 0x1e1   : > { %v1069_v61 = vadd.f32 %v1996_v60, %v1798_v5  ;;  %v1060_v62 = vpop.f32.mrb[31].mxu0  ;;  %2010 = vmatmul.mubr.msk.bf16.gmra.mrb[24].mxu1 %vm766_vm1, %v1093_v53  ;;  %v1086_v0 = vmax.f32 %v1066_v56, 0.0 }
 0x1e2   : > { %v1061_v63 = vadd.f32 %v1798_v5, %v1060_v62  ;;  %v1084_v2 = vmax.f32 %v1058_v59, 0.0  ;;  %v2096_v5 = vld [vmem:[%s2445_s12 + $0x10] sm:$0xff]  }
 0x1e3   : > { %v1087_v1 = vmax.f32 %v1069_v61, 0.0  ;;  %2041 = vmatprep.subr.bf16.mxu1 %v2096_v5 }
 0x1e4   : > { %v1085_v24 = vmax.f32 %v1061_v63, 0.0  ;;  %2042 = vmatpush3.bf16.msra.mxu1 %v2096_v5 }
 0x1e5   : > { %v1095_v23 = vpack.c.bf16 %v1087_v1, %v1086_v0 }
 0x1e6   : > { %v1094_v6 = vpack.c.bf16 %v1085_v24, %v1084_v2 }
 0x1e8   : > { %2013 = vmatprep.mubr.msk.bf16.mxu1 %vm766_vm1, %v1094_v6 }
 0x1e9   : > { %2014 = vmatmul.mubr.msk.bf16.gmra.mrb[28].mxu1 %vm766_vm1, %v1095_v23 }
 0x2a4   : > { %v2003_v10 = vpop.f32.mrb[16].mxu1 }
 0x2a5   : > { %v1186_v11 = vadd.f32 %v2003_v10, %v1809_v9  ;;  %v1177_v12 = vpop.f32.mrb[17].mxu1 }
 0x2a6   : > { %v1178_v13 = vadd.f32 %v1809_v9, %v1177_v12  ;;  %v2004_v15 = vpop.f32.mrb[18].mxu1 }
 0x2a7   : > { %v1189_v16 = vadd.f32 %v2004_v15, %v1809_v9  ;;  %v1180_v17 = vpop.f32.mrb[19].mxu1  ;;  %v1242_v20 = vmax.f32 %v1186_v11, 0.0 }
 0x2a8   : > { %v1181_v18 = vadd.f32 %v1809_v9, %v1180_v17  ;;  %v1240_v22 = vmax.f32 %v1178_v13, 0.0 }
 0x2a9   : > { %v1243_v21 = vmax.f32 %v1189_v16, 0.0 }
 0x2aa   : > { %v1241_v25 = vmax.f32 %v1181_v18, 0.0 }
 0x2ab   : > { %v1257_v26 = vpack.c.bf16 %v1243_v21, %v1242_v20 }
 0x2ac   : > { %v1256_v27 = vpack.c.bf16 %v1241_v25, %v1240_v22  ;;  %v2007_v28 = vpop.f32.mrb[20].mxu1 }
 0x2ad   : > { %v1202_v29 = vadd.f32 %v2007_v28, %v1809_v9  ;;  %v1193_v30 = vpop.f32.mrb[21].mxu1  ;;  %v1265_v34 = vadd.bf16 %v1257_v26, %v2274_v52 }
 0x2ae   : > { %v1264_v31 = vadd.bf16 %v1256_v27, %v2278_v57  ;;  %v1194_v32 = vadd.f32 %v1809_v9, %v1193_v30  ;;  %v2008_v33 = vpop.f32.mrb[22].mxu1 }
 0x2af   : > { %v1205_v35 = vadd.f32 %v2008_v33, %v1809_v9  ;;  %v1196_v36 = vpop.f32.mrb[23].mxu1  ;;  %v1246_v38 = vmax.f32 %v1202_v29, 0.0 }
 0x2b0   : > { %v1197_v37 = vadd.f32 %v1809_v9, %v1196_v36  ;;  %2021 = vmatprep.mubr.msk.bf16.mxu0 %vm766_vm1, %v1264_v31  ;;  %v1244_v40 = vmax.f32 %v1194_v32, 0.0 }
 0x2b1   : > { %v1247_v39 = vmax.f32 %v1205_v35, 0.0  ;;  %2022 = vmatmul.mubr.msk.bf16.vlgmr.msra.gmra.mrb[32].mxu0 %vm766_vm1, %v1265_v34 }
 0x2b2   : > { %v1245_v41 = vmax.f32 %v1197_v37, 0.0 }
 0x2b3   : > { %v1259_v43 = vpack.c.bf16 %v1247_v39, %v1246_v38 }
 0x2b4   : > { %v1258_v44 = vpack.c.bf16 %v1245_v41, %v1244_v40  ;;  %v2011_v45 = vpop.f32.mrb[24].mxu1 }
 0x2b5   : > { %v1218_v46 = vadd.f32 %v2011_v45, %v1809_v9  ;;  %v1209_v57 = vpop.f32.mrb[25].mxu1  ;;  %v1267_v50 = vadd.bf16 %v1259_v43, %v2290_v14 }
 0x2b6   : > { %v1266_v48 = vadd.bf16 %v1258_v44, %v2294_v19  ;;  %v1210_v49 = vadd.f32 %v1809_v9, %v1209_v57  ;;  %v2012_v52 = vpop.f32.mrb[26].mxu1 }
 0x2b7   : > { %v1221_v51 = vadd.f32 %v2012_v52, %v1809_v9  ;;  %v1212_v53 = vpop.f32.mrb[27].mxu1  ;;  %v1250_v55 = vmax.f32 %v1218_v46, 0.0 }
 0x2b8   : > { %v1213_v54 = vadd.f32 %v1809_v9, %v1212_v53  ;;  %2025 = vmatprep.mubr.msk.bf16.mxu0 %vm766_vm1, %v1266_v48  ;;  %v1248_v58 = vmax.f32 %v1210_v49, 0.0 }
 0x2b9   : > { %v1251_v56 = vmax.f32 %v1221_v51, 0.0  ;;  %2026 = vmatmul.mubr.msk.bf16.gmra.mrb[36].mxu0 %vm766_vm1, %v1267_v50 }
 0x2ba   : > { %v1249_v59 = vmax.f32 %v1213_v54, 0.0 }
 0x2bb   : > { %v1261_v60 = vpack.c.bf16 %v1251_v56, %v1250_v55 }
 0x2bc   : > { %v1260_v61 = vpack.c.bf16 %v1249_v59, %v1248_v58  ;;  %v2015_v62 = vpop.f32.mrb[28].mxu1 }
 0x2bd   : > { %v1234_v63 = vadd.f32 %v2015_v62, %v1809_v9  ;;  %v1225_v19 = vpop.f32.mrb[29].mxu1  ;;  %v1269_v2 = vadd.bf16 %v1261_v60, %v2306_v42  ;;  %v2097_v42 = vld [vmem:[%s2445_s12 + $0x18] sm:$0xff]  }
 0x2be   : > { %v1268_v0 = vadd.bf16 %v1260_v61, %v2310_v47  ;;  %v1226_v1 = vadd.f32 %v1809_v9, %v1225_v19  ;;  %v2016_v14 = vpop.f32.mrb[30].mxu1  ;;  %2043 = vmatprep.subr.bf16.mxu1 %v2097_v42 }
 0x2bf   : > { %v1237_v24 = vadd.f32 %v2016_v14, %v1809_v9  ;;  %v1228_v23 = vpop.f32.mrb[31].mxu1  ;;  %v1254_v7 = vmax.f32 %v1234_v63, 0.0  ;;  %2044 = vmatpush3.bf16.msra.mxu1 %v2097_v42 }
 0x2c0   : > { %v1229_v6 = vadd.f32 %v1809_v9, %v1228_v23  ;;  %2029 = vmatprep.mubr.msk.bf16.mxu0 %vm766_vm1, %v1268_v0  ;;  %v1252_v5 = vmax.f32 %v1226_v1, 0.0  ;;  %v1820_v9 = vld [vmem:[%s2444_s11] ss:$0 sm:$0xff] }
 0x2c1   : > { %v1255_v8 = vmax.f32 %v1237_v24, 0.0  ;;  %2030 = vmatmul.mubr.msk.bf16.gmra.mrb[40].mxu0 %vm766_vm1, %v1269_v2 }
 0x2c2   : > { %v1253_v10 = vmax.f32 %v1229_v6, 0.0 }
 0x2c3   : > { %v1263_v11 = vpack.c.bf16 %v1255_v8, %v1254_v7 }
 0x2c4   : > { %v1262_v12 = vpack.c.bf16 %v1253_v10, %v1252_v5  ;;  %v1831_v5 = vld [vmem:[%s2446_s13] ss:$0 sm:$0xff] }
 0x2c5   : > { %v1271_v47 = vadd.bf16 %v1263_v11, %v2322_v3 }
 0x2c6   : > { %v1270_v13 = vadd.bf16 %v1262_v12, %v2324_v4 }
 0x2c8   : > { %2033 = vmatprep.mubr.msk.bf16.mxu0 %vm766_vm1, %v1270_v13 }
 0x2c9   : > { %2034 = vmatmul.mubr.msk.bf16.gmra.mrb[44].mxu0 %vm766_vm1, %v1271_v47 }
 0x384   : > { %v2023_v15 = vpop.f32.mrb[32].mxu0 }
 0x385   : > { %v1362_v16 = vadd.f32 %v2023_v15, %v1820_v9  ;;  %v1353_v17 = vpop.f32.mrb[33].mxu0 }
 0x386   : > { %v1354_v4 = vadd.f32 %v1820_v9, %v1353_v17  ;;  %v2024_v18 = vpop.f32.mrb[34].mxu0 }
 0x387   : > { %v1365_v3 = vadd.f32 %v2024_v18, %v1820_v9  ;;  %v1356_v20 = vpop.f32.mrb[35].mxu0  ;;  %v1418_v22 = vmax.f32 %v1362_v16, 0.0 }
 0x388   : > { %v1357_v21 = vadd.f32 %v1820_v9, %v1356_v20  ;;  %v1416_v26 = vmax.f32 %v1354_v4, 0.0 }
 0x389   : > { %v1419_v25 = vmax.f32 %v1365_v3, 0.0 }
 0x38a   : > { %v1417_v27 = vmax.f32 %v1357_v21, 0.0 }
 0x38b   : > { %v1433_v28 = vpack.c.bf16 %v1419_v25, %v1418_v22 }
 0x38c   : > { %v1432_v29 = vpack.c.bf16 %v1417_v27, %v1416_v26  ;;  %v2027_v30 = vpop.f32.mrb[36].mxu0 }
 0x38d   : > { %v1378_v31 = vadd.f32 %v2027_v30, %v1820_v9  ;;  %v1369_v32 = vpop.f32.mrb[37].mxu0 }
 0x38e   : > { %v1370_v33 = vadd.f32 %v1820_v9, %v1369_v32  ;;  %v2028_v34 = vpop.f32.mrb[38].mxu0  ;;  %2045 = vmatprep.mubr.msk.bf16.mxu1 %vm1479_vm2, %v1432_v29 }
 0x38f   : > { %v1381_v35 = vadd.f32 %v2028_v34, %v1820_v9  ;;  %v1372_v36 = vpop.f32.mrb[39].mxu0  ;;  %2046 = vmatmul.mubr.msk.bf16.vlgmr.msra.gmra.mrb[32].mxu1 %vm1479_vm2, %v1433_v28  ;;  %v1422_v38 = vmax.f32 %v1378_v31, 0.0 }
 0x390   : > { %v1373_v37 = vadd.f32 %v1820_v9, %v1372_v36  ;;  %v1420_v40 = vmax.f32 %v1370_v33, 0.0 }
 0x391   : > { %v1423_v39 = vmax.f32 %v1381_v35, 0.0 }
 0x392   : > { %v1421_v41 = vmax.f32 %v1373_v37, 0.0 }
 0x393   : > { %v1435_v43 = vpack.c.bf16 %v1423_v39, %v1422_v38 }
 0x394   : > { %v1434_v44 = vpack.c.bf16 %v1421_v41, %v1420_v40  ;;  %v2031_v45 = vpop.f32.mrb[40].mxu0 }
 0x395   : > { %v1394_v46 = vadd.f32 %v2031_v45, %v1820_v9  ;;  %v1385_v57 = vpop.f32.mrb[41].mxu0 }
 0x396   : > { %v1386_v48 = vadd.f32 %v1820_v9, %v1385_v57  ;;  %v2032_v49 = vpop.f32.mrb[42].mxu0  ;;  %2049 = vmatprep.mubr.msk.bf16.mxu1 %vm1479_vm2, %v1434_v44 }
 0x397   : > { %v1397_v52 = vadd.f32 %v2032_v49, %v1820_v9  ;;  %v1388_v50 = vpop.f32.mrb[43].mxu0  ;;  %2050 = vmatmul.mubr.msk.bf16.gmra.mrb[36].mxu1 %vm1479_vm2, %v1435_v43  ;;  %v1426_v53 = vmax.f32 %v1394_v46, 0.0 }
 0x398   : > { %v1389_v51 = vadd.f32 %v1820_v9, %v1388_v50  ;;  %v1424_v55 = vmax.f32 %v1386_v48, 0.0 }
 0x399   : > { %v1427_v54 = vmax.f32 %v1397_v52, 0.0 }
 0x39a   : > { %v1425_v56 = vmax.f32 %v1389_v51, 0.0 }
 0x39b   : > { %v1437_v58 = vpack.c.bf16 %v1427_v54, %v1426_v53 }
 0x39c   : > { %v1436_v59 = vpack.c.bf16 %v1425_v56, %v1424_v55  ;;  %v2035_v60 = vpop.f32.mrb[44].mxu0 }
 0x39d   : > { %v1410_v61 = vadd.f32 %v2035_v60, %v1820_v9  ;;  %v1401_v62 = vpop.f32.mrb[45].mxu0 }
 0x39e   : > { %v1402_v63 = vadd.f32 %v1820_v9, %v1401_v62  ;;  %v2036_v19 = vpop.f32.mrb[46].mxu0  ;;  %2053 = vmatprep.mubr.msk.bf16.mxu1 %vm1479_vm2, %v1436_v59 }
 0x39f   : > { %v1413_v0 = vadd.f32 %v2036_v19, %v1820_v9  ;;  %v1404_v1 = vpop.f32.mrb[47].mxu0  ;;  %2054 = vmatmul.mubr.msk.bf16.gmra.mrb[40].mxu1 %vm1479_vm2, %v1437_v58  ;;  %v1430_v2 = vmax.f32 %v1410_v61, 0.0 }
 0x3a0   : > { %v1405_v14 = vadd.f32 %v1820_v9, %v1404_v1  ;;  %v1428_v23 = vmax.f32 %v1402_v63, 0.0 }
 0x3a1   : > { %v1431_v24 = vmax.f32 %v1413_v0, 0.0 }
 0x3a2   : > { %v1429_v6 = vmax.f32 %v1405_v14, 0.0 }
 0x3a3   : > { %v1439_v7 = vpack.c.bf16 %v1431_v24, %v1430_v2 }
 0x3a4   : > { %v1438_v8 = vpack.c.bf16 %v1429_v6, %v1428_v23 }
 0x3a6   : > { %2057 = vmatprep.mubr.msk.bf16.mxu1 %vm1479_vm2, %v1438_v8 }
 0x3a7   : > { %2058 = vmatmul.mubr.msk.bf16.gmra.mrb[44].mxu1 %vm1479_vm2, %v1439_v7 }
 0x462   : > { %v2047_v10 = vpop.f32.mrb[32].mxu1 }
 0x463   : > { %v1547_v11 = vadd.f32 %v2047_v10, %v1831_v5  ;;  %v1538_v12 = vpop.f32.mrb[33].mxu1 }
 0x464   : > { %v1539_v13 = vadd.f32 %v1831_v5, %v1538_v12  ;;  %v2048_v47 = vpop.f32.mrb[34].mxu1 }
 0x465   : > { %v1864_v42 = vpack.c.bf16 %v1547_v11, %v1547_v11  ;;  %v1550_v9 = vadd.f32 %v2048_v47, %v1831_v5  ;;  %v1541_v15 = vpop.f32.mrb[35].mxu1 }
 0x466   : > { %v1862_v16 = vpack.c.bf16 %v1539_v13, %v1539_v13  ;;  %v1542_v17 = vadd.f32 %v1831_v5, %v1541_v15 }
 0x467   : > { %1668 = vst.msk [vmem:[%s2396_s20 + $0x8] sm:$0xf] %vm1665_vm3, %v1864_v42  ;;  %v1865_v4 = vpack.c.bf16 %v1550_v9, %v1550_v9 }
 0x468   : > { %1666 = vst.msk [vmem:[%s2396_s20] sm:$0xf] %vm1665_vm3, %v1862_v16  ;;  %v1863_v18 = vpack.c.bf16 %v1542_v17, %v1542_v17 }
 0x469   : > { %1669 = vst.msk [vmem:[%s2396_s20 + $0xc] sm:$0xf] %vm1665_vm3, %v1865_v4 }
 0x46a   : > { %1667 = vst.msk [vmem:[%s2396_s20 + $0x4] sm:$0xf] %vm1665_vm3, %v1863_v18  ;;  %v2051_v3 = vpop.f32.mrb[36].mxu1 }
 0x46b   : > { %v1563_v20 = vadd.f32 %v2051_v3, %v1831_v5  ;;  %v1554_v21 = vpop.f32.mrb[37].mxu1 }
 0x46c   : > { %v1555_v22 = vadd.f32 %v1831_v5, %v1554_v21  ;;  %v2052_v25 = vpop.f32.mrb[38].mxu1 }
 0x46d   : > { %v1868_v26 = vpack.c.bf16 %v1563_v20, %v1563_v20  ;;  %v1566_v27 = vadd.f32 %v2052_v25, %v1831_v5  ;;  %v1557_v28 = vpop.f32.mrb[39].mxu1 }
 0x46e   : > { %v1866_v29 = vpack.c.bf16 %v1555_v22, %v1555_v22  ;;  %v1558_v30 = vadd.f32 %v1831_v5, %v1557_v28 }
 0x46f   : > { %1672 = vst.msk [vmem:[%s2396_s20 + $0x18] sm:$0xf] %vm1665_vm3, %v1868_v26  ;;  %v1869_v31 = vpack.c.bf16 %v1566_v27, %v1566_v27 }
 0x470   : > { %1670 = vst.msk [vmem:[%s2396_s20 + $0x10] sm:$0xf] %vm1665_vm3, %v1866_v29  ;;  %v1867_v32 = vpack.c.bf16 %v1558_v30, %v1558_v30 }
 0x471   : > { %1673 = vst.msk [vmem:[%s2396_s20 + $0x1c] sm:$0xf] %vm1665_vm3, %v1869_v31 }
 0x472   : > { %1671 = vst.msk [vmem:[%s2396_s20 + $0x14] sm:$0xf] %vm1665_vm3, %v1867_v32  ;;  %v2055_v33 = vpop.f32.mrb[40].mxu1 }
 0x473   : > { %v1579_v34 = vadd.f32 %v2055_v33, %v1831_v5  ;;  %v1570_v35 = vpop.f32.mrb[41].mxu1 }
 0x474   : > { %v1571_v36 = vadd.f32 %v1831_v5, %v1570_v35  ;;  %v2056_v37 = vpop.f32.mrb[42].mxu1 }
 0x475   : > { %v1872_v38 = vpack.c.bf16 %v1579_v34, %v1579_v34  ;;  %v1582_v39 = vadd.f32 %v2056_v37, %v1831_v5  ;;  %v1573_v40 = vpop.f32.mrb[43].mxu1 }
 0x476   : > { %v1870_v41 = vpack.c.bf16 %v1571_v36, %v1571_v36  ;;  %v1574_v43 = vadd.f32 %v1831_v5, %v1573_v40 }
 0x477   : > { %1676 = vst.msk [vmem:[%s2396_s20 + $0x28] sm:$0xf] %vm1665_vm3, %v1872_v38  ;;  %v1873_v44 = vpack.c.bf16 %v1582_v39, %v1582_v39 }
 0x478   : > { %1674 = vst.msk [vmem:[%s2396_s20 + $0x20] sm:$0xf] %vm1665_vm3, %v1870_v41  ;;  %v1871_v45 = vpack.c.bf16 %v1574_v43, %v1574_v43 }
 0x479   : > { %1677 = vst.msk [vmem:[%s2396_s20 + $0x2c] sm:$0xf] %vm1665_vm3, %v1873_v44 }
 0x47a   : > { %1675 = vst.msk [vmem:[%s2396_s20 + $0x24] sm:$0xf] %vm1665_vm3, %v1871_v45  ;;  %v2059_v46 = vpop.f32.mrb[44].mxu1 }
 0x47b   : > { %v1595_v57 = vadd.f32 %v2059_v46, %v1831_v5  ;;  %v1586_v48 = vpop.f32.mrb[45].mxu1 }
 0x47c   : > { %v1587_v49 = vadd.f32 %v1831_v5, %v1586_v48  ;;  %v2060_v52 = vpop.f32.mrb[46].mxu1 }
 0x47d   : > { %v1876_v50 = vpack.c.bf16 %v1595_v57, %v1595_v57  ;;  %v1598_v51 = vadd.f32 %v2060_v52, %v1831_v5  ;;  %v1589_v53 = vpop.f32.mrb[47].mxu1 }
 0x47e   : > { %v1874_v54 = vpack.c.bf16 %v1587_v49, %v1587_v49  ;;  %v1590_v55 = vadd.f32 %v1831_v5, %v1589_v53 }
 0x47f   : > { %1680 = vst.msk [vmem:[%s2396_s20 + $0x38] sm:$0xf] %vm1665_vm3, %v1876_v50  ;;  %v1877_v56 = vpack.c.bf16 %v1598_v51, %v1598_v51 }
 0x480   : > { %1678 = vst.msk [vmem:[%s2396_s20 + $0x30] sm:$0xf] %vm1665_vm3, %v1874_v54  ;;  %v1875_v58 = vpack.c.bf16 %v1590_v55, %v1590_v55 }
 0x481   : > { %1681 = vst.msk [vmem:[%s2396_s20 + $0x3c] sm:$0xf] %vm1665_vm3, %v1877_v56 }
 0x482   : > { %1679 = vst.msk [vmem:[%s2396_s20 + $0x34] sm:$0xf] %vm1665_vm3, %v1875_v58 }
 0x483 PF: > { %s24_s29 = sadd.s32 1, %s2104_s29  }
 0x484   : > { %p21_p4 = scmp.ge.s32.totalorder %s24_s29, 10  }
 0x486   :  { %23 = sbr.rel (!%p21_p4) target bundleno = 1 (0x1), region = 109 }

</bundles_post_ra>
